<compile_context>
chip_gen: v7x
topology: tpu7x:2x2x1
jax: 0.10.0
libtpu: 0.0.40
codegen_flags: <defaults>
</compile_context>

<pallas_src>
import math
import functools

import jax
import jax.numpy as jnp
from jax.experimental import pallas as pl
from jax.experimental.pallas import tpu as pltpu


def _round_up(x, m):
    return ((x + m - 1) // m) * m


def _choose_tile(B, tb, sublane):
    # Big tile (amortizes the ~0.35us per-grid-step overhead) but capped so
    # the batch splits into >=2 tiles when possible (megacore sharding).
    half = _round_up(max(-(-B // 2), 1), sublane)
    tb_eff = max(sublane, min(_round_up(tb, sublane), half))
    B_pad = _round_up(B, tb_eff)
    return tb_eff, B_pad


def _transe_loss_kernel(x_ref, out_ref, *, gamma, d_norm, batch):
    """x_ref: (2, tb, D) block [pos_dis, neg_dis]; out_ref: (1, 1) partial sum."""
    i = pl.program_id(0)
    tb = x_ref.shape[1]

    pos_dis = x_ref[0].astype(jnp.float32)   # [tb, D]
    neg_dis = x_ref[1].astype(jnp.float32)   # [tb, D]

    if d_norm == 1:
        pos_n = jnp.sum(jnp.abs(pos_dis), axis=1, keepdims=True)   # [tb, 1]
        neg_n = jnp.sum(jnp.abs(neg_dis), axis=1, keepdims=True)
    else:  # L2 norm (module default d_norm=2)
        pos_n = jnp.sqrt(jnp.sum(pos_dis * pos_dis, axis=1, keepdims=True))
        neg_n = jnp.sqrt(jnp.sum(neg_dis * neg_dis, axis=1, keepdims=True))

    relu = jnp.maximum(gamma + pos_n - neg_n, 0.0)                  # [tb, 1]

    # Mask rows beyond the true batch.  Padded rows were produced by padding
    # the *index* vectors with 0, so they contain valid data (no NaN risk).
    row = jax.lax.broadcasted_iota(jnp.int32, (tb, 1), 0) + i * tb
    relu = jnp.where(row < batch, relu, 0.0)

    out_ref[...] = jnp.sum(relu, keepdims=True)                     # (1, 1)


def transe_forward(entity_emb, relation_emb,
                   pos_head, pos_relation, pos_tail,
                   neg_head, neg_relation, neg_tail,
                   gamma=1.0, d_norm=2, tb=4096):
    """Mirrors TranE.forward: sum(relu(gamma + ||h+r-t|| - ||h'+r'-t'||))."""
    B = int(pos_head.shape[0])
    D = entity_emb.shape[1]
    sublane = 16 if entity_emb.dtype.itemsize == 2 else 8
    tb_eff, B_pad = _choose_tile(B, tb, sublane)

    if B_pad != B:
        pad = (0, B_pad - B)          # pad the tiny index vectors, not [*,B,D]
        pos_head = jnp.pad(pos_head, pad)
        pos_relation = jnp.pad(pos_relation, pad)
        pos_tail = jnp.pad(pos_tail, pad)
        neg_head = jnp.pad(neg_head, pad)
        neg_relation = jnp.pad(neg_relation, pad)
        neg_tail = jnp.pad(neg_tail, pad)

    # Gather + pre-reduce in the wrapper (XLA fuses this into a single
    # [2, B_pad, D] producer), so the kernel reads 2*B*D instead of 6*B*D.
    pos_dis = (jnp.take(entity_emb, pos_head, axis=0)
               + jnp.take(relation_emb, pos_relation, axis=0)
               - jnp.take(entity_emb, pos_tail, axis=0))
    neg_dis = (jnp.take(entity_emb, neg_head, axis=0)
               + jnp.take(relation_emb, neg_relation, axis=0)
               - jnp.take(entity_emb, neg_tail, axis=0))
    stacked = jnp.stack([pos_dis, neg_dis], axis=0)          # [2, B_pad, D]

    num_tiles = B_pad // tb_eff
    kernel = functools.partial(_transe_loss_kernel,
                               gamma=float(gamma), d_norm=int(d_norm),
                               batch=B)

    partials = pl.pallas_call(
        kernel,
        out_shape=jax.ShapeDtypeStruct((num_tiles, 1), jnp.float32),
        grid_spec=pltpu.PrefetchScalarGridSpec(
            num_scalar_prefetch=0,
            grid=(num_tiles,),
            in_specs=[pl.BlockSpec((2, tb_eff, D), lambda i: (0, i, 0))],
            out_specs=pl.BlockSpec((1, 1), lambda i: (i, 0)),
        ),
        compiler_params=pltpu.CompilerParams(
            dimension_semantics=("parallel",)),
    )(stacked)

    return jnp.sum(partials)


if __name__ == "__main__":
    # Module hyperparameters (matching TranE.__init__ defaults)
    entity_num, relation_num, dim = 32, 8, 50
    d_norm, gamma = 2, 1.0
    batch = 8

    key = jax.random.PRNGKey(0)
    k_ent, k_rel, k_ph, k_pr, k_pt, k_nh, k_nr, k_nt = jax.random.split(key, 8)

    bound = 6.0 / math.sqrt(dim)
    entity_emb = jax.random.uniform(
        k_ent, (entity_num, dim), minval=-bound, maxval=bound, dtype=jnp.float32)
    relation_emb = jax.random.uniform(
        k_rel, (relation_num, dim), minval=-bound, maxval=bound, dtype=jnp.float32)
    # row-normalize relation embeddings (as in __init__)
    relation_emb = relation_emb / jnp.linalg.norm(relation_emb, axis=1, keepdims=True)

    pos_head = jax.random.randint(k_ph, (batch,), 0, entity_num, dtype=jnp.int32)
    pos_rel  = jax.random.randint(k_pr, (batch,), 0, relation_num, dtype=jnp.int32)
    pos_tail = jax.random.randint(k_pt, (batch,), 0, entity_num, dtype=jnp.int32)
    neg_head = jax.random.randint(k_nh, (batch,), 0, entity_num, dtype=jnp.int32)
    neg_rel  = jax.random.randint(k_nr, (batch,), 0, relation_num, dtype=jnp.int32)
    neg_tail = jax.random.randint(k_nt, (batch,), 0, entity_num, dtype=jnp.int32)

    def ref_loss(ee, re, ph, pr, pt, nh, nr, nt, p):
        pd = (jnp.take(ee, ph, 0) + jnp.take(re, pr, 0) - jnp.take(ee, pt, 0)
              ).astype(jnp.float32)
        nd = (jnp.take(ee, nh, 0) + jnp.take(re, nr, 0) - jnp.take(ee, nt, 0)
              ).astype(jnp.float32)
        if p == 1:
            pn = jnp.sum(jnp.abs(pd), axis=1)
            nn = jnp.sum(jnp.abs(nd), axis=1)
        else:
            pn = jnp.linalg.norm(pd, axis=1)
            nn = jnp.linalg.norm(nd, axis=1)
        return jnp.sum(jnp.maximum(gamma + pn - nn, 0.0))

    # 1) small batch, L2 norm
    loss = jax.block_until_ready(
        transe_forward(entity_emb, relation_emb,
                       pos_head, pos_rel, pos_tail, neg_head, neg_rel, neg_tail,
                       gamma=gamma, d_norm=2))
    ref = jax.block_until_ready(
        ref_loss(entity_emb, relation_emb,
                 pos_head, pos_rel, pos_tail, neg_head, neg_rel, neg_tail, 2))
    assert jnp.allclose(loss, ref, rtol=1e-5, atol=1e-5), (loss, ref)

    # 2) small batch, L1 norm
    loss1 = jax.block_until_ready(
        transe_forward(entity_emb, relation_emb,
                       pos_head, pos_rel, pos_tail, neg_head, neg_rel, neg_tail,
                       gamma=gamma, d_norm=1))
    ref1 = jax.block_until_ready(
        ref_loss(entity_emb, relation_emb,
                 pos_head, pos_rel, pos_tail, neg_head, neg_rel, neg_tail, 1))
    assert jnp.allclose(loss1, ref1, rtol=1e-5, atol=1e-5), (loss1, ref1)

    # 3) ragged / larger batch (index padding + in-kernel mask + multiple tiles)
    big_batch = 300
    kb = jax.random.split(jax.random.PRNGKey(1), 6)
    bph = jax.random.randint(kb[0], (big_batch,), 0, entity_num, dtype=jnp.int32)
    bpr = jax.random.randint(kb[1], (big_batch,), 0, relation_num, dtype=jnp.int32)
    bpt = jax.random.randint(kb[2], (big_batch,), 0, entity_num, dtype=jnp.int32)
    bnh = jax.random.randint(kb[3], (big_batch,), 0, entity_num, dtype=jnp.int32)
    bnr = jax.random.randint(kb[4], (big_batch,), 0, relation_num, dtype=jnp.int32)
    bnt = jax.random.randint(kb[5], (big_batch,), 0, entity_num, dtype=jnp.int32)
    big = jax.block_until_ready(
        transe_forward(entity_emb, relation_emb, bph, bpr, bpt, bnh, bnr, bnt,
                       gamma=gamma, d_norm=2, tb=128))
    ref_b = jax.block_until_ready(
        ref_loss(entity_emb, relation_emb, bph, bpr, bpt, bnh, bnr, bnt, 2))
    assert jnp.allclose(big, ref_b, rtol=1e-4, atol=1e-4), (big, ref_b)

    # 4) bf16 embeddings (halved HBM read bytes; kernel upcasts to f32)
    ee16 = entity_emb.astype(jnp.bfloat16)
    re16 = relation_emb.astype(jnp.bfloat16)
    mb = 64
    km = jax.random.split(jax.random.PRNGKey(2), 6)
    mph = jax.random.randint(km[0], (mb,), 0, entity_num, dtype=jnp.int32)
    mpr = jax.random.randint(km[1], (mb,), 0, relation_num, dtype=jnp.int32)
    mpt = jax.random.randint(km[2], (mb,), 0, entity_num, dtype=jnp.int32)
    mnh = jax.random.randint(km[3], (mb,), 0, entity_num, dtype=jnp.int32)
    mnr = jax.random.randint(km[4], (mb,), 0, relation_num, dtype=jnp.int32)
    mnt = jax.random.randint(km[5], (mb,), 0, entity_num, dtype=jnp.int32)
    lo16 = jax.block_until_ready(
        transe_forward(ee16, re16, mph, mpr, mpt, mnh, mnr, mnt,
                       gamma=gamma, d_norm=2))
    ref16 = jax.block_until_ready(
        ref_loss(ee16, re16, mph, mpr, mpt, mnh, mnr, mnt, 2))
    assert jnp.allclose(lo16, ref16, rtol=5e-3, atol=5e-3), (lo16, ref16)

    print("KERNEL_OK")
</pallas_src>

<mosaic_0001>
module attributes {stable_mosaic.version = 11 : i64} {
  func.func @_transe_loss_kernel(%arg0: i32, %arg1: memref<2x8x50xf32, #tpu.memory_space<vmem>>, %arg2: memref<1x1xf32, #tpu.memory_space<vmem>>) attributes {dimension_semantics = [#tpu.dimension_semantics<parallel>], iteration_bounds = array<i64: 1>, scalar_prefetch = 0 : i64, scratch_operands = 0 : i64, tpu.core_type = #tpu.core_type<tc>, window_params = [{transform_indices = @transform_0, window_bounds = array<i64: 2, 8, 50>}, {transform_indices = @transform_1, window_bounds = array<i64: 1, 1>}]} {
    %c0 = arith.constant 0 : index
    %c0_0 = arith.constant 0 : index
    %c0_1 = arith.constant 0 : index
    %0 = vector.load %arg1[%c0, %c0_0, %c0_1] : memref<2x8x50xf32, #tpu.memory_space<vmem>>, vector<1x8x50xf32>
    %1 = vector.shape_cast %0 : vector<1x8x50xf32> to vector<8x50xf32>
    %c1 = arith.constant 1 : index
    %c0_2 = arith.constant 0 : index
    %c0_3 = arith.constant 0 : index
    %2 = vector.load %arg1[%c1, %c0_2, %c0_3] : memref<2x8x50xf32, #tpu.memory_space<vmem>>, vector<1x8x50xf32>
    %3 = vector.shape_cast %2 : vector<1x8x50xf32> to vector<8x50xf32>
    %4 = arith.mulf %1, %1 : vector<8x50xf32>
    %cst = arith.constant dense<0.000000e+00> : vector<8xf32>
    %5 = vector.multi_reduction <add>, %4, %cst [1] : vector<8x50xf32> to vector<8xf32>
    %6 = vector.shape_cast %5 : vector<8xf32> to vector<8x1xf32>
    %7 = math.sqrt %6 : vector<8x1xf32>
    %8 = arith.mulf %3, %3 : vector<8x50xf32>
    %cst_4 = arith.constant dense<0.000000e+00> : vector<8xf32>
    %9 = vector.multi_reduction <add>, %8, %cst_4 [1] : vector<8x50xf32> to vector<8xf32>
    %10 = vector.shape_cast %9 : vector<8xf32> to vector<8x1xf32>
    %11 = math.sqrt %10 : vector<8x1xf32>
    %cst_5 = arith.constant 1.000000e+00 : f32
    %12 = vector.broadcast %cst_5 : f32 to vector<8x1xf32>
    %13 = arith.addf %12, %7 : vector<8x1xf32>
    %14 = arith.subf %13, %11 : vector<8x1xf32>
    %cst_6 = arith.constant 0.000000e+00 : f32
    %15 = vector.broadcast %cst_6 : f32 to vector<8x1xf32>
    %16 = arith.maximumf %14, %15 : vector<8x1xf32>
    %17 = tpu.iota {dimensions = array<i32: 0>} : vector<8x1xi32>
    %c8_i32 = arith.constant 8 : i32
    %18 = arith.muli %arg0, %c8_i32 : i32
    %19 = vector.broadcast %18 : i32 to vector<8x1xi32>
    %20 = arith.addi %17, %19 : vector<8x1xi32>
    %c8_i32_7 = arith.constant 8 : i32
    %21 = vector.broadcast %c8_i32_7 : i32 to vector<8x1xi32>
    %22 = arith.cmpi slt, %20, %21 : vector<8x1xi32>
    %cst_8 = arith.constant 0.000000e+00 : f32
    %23 = vector.broadcast %cst_8 : f32 to vector<8x1xf32>
    %24 = arith.select %22, %16, %23 : vector<8x1xi1>, vector<8x1xf32>
    %25 = vector.shape_cast %24 : vector<8x1xf32> to vector<1x8x1xf32>
    %cst_9 = arith.constant dense<0.000000e+00> : vector<1xf32>
    %26 = vector.multi_reduction <add>, %25, %cst_9 [1, 2] : vector<1x8x1xf32> to vector<1xf32>
    %27 = vector.shape_cast %26 : vector<1xf32> to vector<1x1x1xf32>
    %28 = vector.extract %27[0, 0, 0] : f32 from vector<1x1x1xf32>
    %29 = vector.broadcast %28 : f32 to vector<1x1xf32>
    %c0_10 = arith.constant 0 : index
    %c0_11 = arith.constant 0 : index
    %30 = vector.load %arg2[%c0_10, %c0_11] : memref<1x1xf32, #tpu.memory_space<vmem>>, vector<1x1xf32>
    tpu.vector_store %arg2[%c0_10, %c0_11], %29 {strides = array<i32>} : memref<1x1xf32, #tpu.memory_space<vmem>>, vector<1x1xf32>,
    return
  }
  func.func @transform_0(%arg0: i32) -> (i32, i32, i32) {
    %c0_i32 = arith.constant 0 : i32
    %c0_i32_0 = arith.constant 0 : i32
    %c0_i32_1 = arith.constant 0 : i32
    return %c0_i32, %arg0, %c0_i32_0 : i32, i32, i32
  }
  func.func @transform_1(%arg0: i32) -> (i32, i32) {
    %c0_i32 = arith.constant 0 : i32
    %c0_i32_0 = arith.constant 0 : i32
    return %arg0, %c0_i32 : i32, i32
  }
}

</mosaic_0001>

<bundles_post_ra>
// kernel: tpu_custom_call.1
= control target key start
LH: loop header
LB: loop body
LE: loop exit
PB: predicated region body
PF: predicated region fallthrough
CT: control target
= control target key end

     0   :  { %6 = vsyncpa [#allocation3], 0  ;;  %s184_s0 = inlined_call_operand.hbm [shape: f32[2,8,50], index: 0, kind: input, shape index: {}]   ;;  %s185_s1 = inlined_call_operand.hbm [shape: f32[1,1], index: 1, kind: output, shape index: {}]  }
   0x1   :  { %7 = vsyncpa [#allocation4], 0  ;;  %s146_s6 = smov [#allocation2]   ;;  %s98_s10 = scalar_lea.hbm %s184_s0, 256 }
   0x2   :  { %s13_s7 = sshll.u32 %s146_s6, 4  ;;  %p99_p0 = scmp.ne.s32.totalorder %s184_s0, %s98_s10  ;;  %s14_s7 = int_to_ptr.vmem [resolvable:$true] %s13_s7 }
   0x3   :  { %p102_p1 = scmp.lt.u32.totalorder %s98_s10, %s184_s0 }
   0x5   :  { %p104_p2 = pnand %p102_p1, %p99_p0 }
   0x7   :  { %107 = shalt.err (!%p104_p2)
}
   0x8   :  { %s108_s15 = scalar_lea.vmem %s14_s7, 256  ;;  %p113_p4 = scmp.lt.s32.totalorder %s14_s7, %s14_s7 }
   0x9   :  { %p109_p3 = scmp.ne.s32.totalorder %s14_s7, %s108_s15  ;;  %p114_p5 = scmp.lt.s32.totalorder %s108_s15, %s108_s15 }
   0xb   :  { %p115_p6 = por %p114_p5, %p113_p4 }
   0xd   :  { %p116_p7 = pnand %p115_p6, %p109_p3 }
   0xf   :  { %119 = shalt.err (!%p116_p7)
}
  0x10   :  { %s147_s16 = smov 128   ;;  %s148_s17 = smov 8  }
  0x11   :  { %19 = dma.hbm_to_vmem [thread:$0]  %s184_s0, 256, %s14_s7, [#allocation3], %s147_s16, %s147_s16, %s148_s17  }
  0x12   :  { %142 = dma.done.wait [#allocation3], 256  }
  0x13   :  { %143 = vsyncadd [#allocation3], 4294967040  ;;  %v23_v0 = vld [vmem:[#allocation2] sm:$0xff]  ;;  %vm27_vm0 = vcmask 408576   ;;  %v25_v1 = vld [vmem:[#allocation2 + $0x8] sm:$0xff]  ;;  %vm59_vm5 = vcmask 7168  }
  0x14   :  { %v26_v2 = vmul.f32 %v23_v0, %v23_v0  ;;  %v38_v3 = vmul.f32 %v25_v1, %v25_v1  ;;  %s149_s0 = smov [#allocation5]   ;;  %vm71_vm6 = vcmask 0  }
  0x15   :  { %s79_s20 = sshll.u32 %s149_s0, 4  ;;  %s80_s20 = int_to_ptr.vmem [resolvable:$true] %s79_s20 }
  0x16   :  { %v28_v4 = vsel %vm27_vm0, %v26_v2, 0.0  ;;  %v39_v5 = vsel %vm27_vm0, %v38_v3, 0.0  ;;  %s120_s22 = scalar_lea.vmem %s80_s20, 16  ;;  %s124_s23 = scalar_lea.vmem %s80_s20, 32 }
  0x17   :  { %29 = vadd.xlane.f32.xlu0 %v28_v4  ;;  %p121_p8 = scmp.ne.s32.totalorder %s80_s20, %s120_s22  ;;  %p125_p9 = scmp.lt.s32.totalorder %s80_s20, %s80_s20 }
  0x18   :  { %p126_p10 = scmp.lt.s32.totalorder %s124_s23, %s120_s22 }
  0x1a   :  { %p127_p11 = por %p126_p10, %p125_p9 }
  0x1b   :  { %40 = vadd.xlane.f32.xlu0 %v39_v5 }
  0x1c   :  { %p128_p12 = pnand %p127_p11, %p121_p8 }
  0xa4   :  { %v30_v6 = vpop.xlane.xlu0 %29 }
  0xa5   :  { %94 = vrsqrt.f32 %v30_v6  ;;  %vm33_vm1 = vcmp.eq.f32.partialorder %v30_v6, inf  ;;  %v36_v10 = vand.u32 2147483648, %v30_v6  ;;  %vm35_vm2 = vcmp.eq.f32.partialorder %v30_v6, 0.0 }
  0xa8   :  { %v41_v7 = vpop.xlane.xlu0 %40 }
  0xa9   :  { %96 = vrsqrt.f32 %v41_v7  ;;  %vm44_vm3 = vcmp.eq.f32.partialorder %v41_v7, inf  ;;  %v47_v15 = vand.u32 2147483648, %v41_v7  ;;  %vm46_vm4 = vcmp.eq.f32.partialorder %v41_v7, 0.0 }
  0xaf   :  { %v95_v8 = vpop.eup %94 }
  0xb0   :  { %v32_v9 = vmul.f32 %v95_v8, %v30_v6 }
  0xb2   :  { %v34_v11 = vsel %vm33_vm1, %v30_v6, %v32_v9 }
  0xb3   :  { %v97_v12 = vpop.eup %96  ;;  %v37_v13 = vsel %vm35_vm2, %v36_v10, %v34_v11 }
  0xb4   :  { %v43_v14 = vmul.f32 %v97_v12, %v41_v7  ;;  %v49_v17 = vadd.f32 1.0, %v37_v13 }
  0xb6   :  { %v45_v16 = vsel %vm44_vm3, %v41_v7, %v43_v14 }
  0xb7   :  { %v48_v18 = vsel %vm46_vm4, %v47_v15, %v45_v16 }
  0xb8   :  { %v50_v19 = vsub.f32 %v49_v17, %v48_v18 }
  0xba   :  { %v51_v20 = vmax.f32 %v50_v19, 0.0 }
  0xbc   :  { %v60_v21 = vsel %vm59_vm5, %v51_v20, 0.0 }
  0xbd   :  { %61 = vadd.xlane.f32.xlu1 %v60_v21 }
 0x14a   :  { %v62_v22 = vpop.xlane.xlu1 %61 }
 0x14b   :  { %v63_v23 = vrot.slane %v62_v22, 4 }
 0x14d   :  { %v64_v24 = vadd.f32 %v63_v23, %v62_v22 }
 0x14f   :  { %v65_v25 = vrot.slane %v64_v24, 2 }
 0x151   :  { %v66_v26 = vadd.f32 %v65_v25, %v64_v24 }
 0x153   :  { %v67_v27 = vrot.slane %v66_v26, 1 }
 0x155   :  { %v68_v28 = vadd.f32 %v67_v27, %v66_v26 }
 0x157   :  { %88 = vpush %v68_v28 }
 0x188   :  { %s89_s21 = spop %88 }
 0x189   :  { %v70_v29 = vstv %s89_s21 }
 0x18a   :  { %72 = vst.msk [vmem:[#allocation5] sm:$0x1] %vm71_vm6, %v70_v29 }
 0x18b   :  { %131 = shalt.err (!%p128_p12)
}
 0x18c   :  { %s132_s26 = scalar_lea.hbm %s185_s1, 16 }
 0x18d   :  { %p133_p13 = scmp.ne.s32.totalorder %s185_s1, %s132_s26  ;;  %p136_p0 = scmp.lt.u32.totalorder %s132_s26, %s185_s1 }
 0x18f   :  { %p138_p1 = pnand %p136_p0, %p133_p13 }
 0x191   :  { %141 = shalt.err (!%p138_p1)
}
 0x192   :  { %82 = dma.vmem_to_hbm [thread:$0]  %s80_s20, 16, %s185_s1, [#allocation4]  }
 0x193   :  { %144 = dma.done.wait [#allocation4], 16  }
 0x194   :  { %145 = vsyncadd [#allocation4], 4294967280 }
 0x195   :  { %86 = vsyncpa [#allocation3], 1 }
 0x196   :  { %87 = vsyncpa [#allocation4], 1 }

</bundles_post_ra>
